<compile_context>
chip_gen: v6e
topology: v6e:2x2x1
jax: 0.10.0
libtpu: 0.0.40
codegen_flags: <defaults>
</compile_context>

<pallas_src>
import numpy as np

import jax
import jax.numpy as jnp
from jax.experimental import pallas as pl
from jax.experimental.pallas import tpu as pltpu

KERNEL_SIZES = (13, 17)  # default kernel_size of series_decomp_multi
_LANE = 128
_LANE_TILE_CAP = 512


def _round_up(n, m):
    return ((n + m - 1) // m) * m


# ---------------------------------------------------------------------------
# constant weight matrix: replicate-pad + AvgPool1d + average over kernels
# ---------------------------------------------------------------------------
def _build_weight_matrix(L, kernel_sizes):
    """A[l, j] such that mean[l] = sum_j A[l, j] * x[j] reproduces
    mean_over_kernels( AvgPool1d(k, stride=1)(replicate_pad(x, (k-1)//2)) )."""
    A = np.zeros((L, L), np.float64)
    for k in kernel_sizes:
        assert k % 2 == 1, "series_decomp_multi kernel assumes odd kernel sizes"
        p = (k - 1) // 2
        Wk = np.zeros((L, L), np.float64)
        for l in range(L):
            for t in range(k):
                j = min(max(l + t - p, 0), L - 1)  # replicate padding -> clamp
                Wk[l, j] += 1.0 / k
        A += Wk / len(kernel_sizes)
    return jnp.asarray(A, dtype=jnp.float32)


# ---------------------------------------------------------------------------
# kernel: one MXU dot + one subtract per (L, T) lane tile
# ---------------------------------------------------------------------------
def _decomp_kernel(a_ref, x_ref, sea_ref, mean_ref):
    x = x_ref[...]                               # native dtype, no up-cast
    mean = jnp.dot(a_ref[...], x, preferred_element_type=jnp.float32)
    sea_ref[...] = (x.astype(jnp.float32) - mean).astype(sea_ref.dtype)
    mean_ref[...] = mean.astype(mean_ref.dtype)


def _lane_tile(n, other_parallel_steps, cap=_LANE_TILE_CAP):
    """Lane-tile width: full width for tiny n, else a multiple of 128 (the
    partial edge block is masked by Pallas).  Shrinks the tile if needed so
    the parallel grid has >= 2 steps (v7x has 2 TensorCores per chip)."""
    if n <= _LANE:
        return n
    t = min(cap, _round_up(n, _LANE))
    while other_parallel_steps * pl.cdiv(n, t) < 2 and t > _LANE:
        t = _round_up(t // 2, _LANE)
    return t


def _vmem_limit_bytes(L, tile, x_itemsize, a_itemsize):
    a = 2 * L * L * a_itemsize          # constant A block (double-buffered)
    io = 3 * 2 * L * tile * x_itemsize  # x, sea, mean blocks (double-buffered)
    tmp = 2 * L * tile * 4              # f32 intermediates
    need = int((a + io + tmp) * 1.5) + (2 << 20)
    return min(max(need, 16 << 20), 64 << 20)  # 64 MiB = v7x per-core VMEM


def series_decomp_multi(x, kernel_sizes=KERNEL_SIZES):
    """x: (B, L, C)  ->  (sea, moving_mean), both (B, L, C)."""
    B, L, C = x.shape
    A = _build_weight_matrix(L, kernel_sizes)
    if jnp.issubdtype(x.dtype, jnp.floating) and jnp.finfo(x.dtype).bits < 32:
        A = A.astype(x.dtype)  # native bf16 x bf16 -> f32 MXU path

    flops = 2 * L * L * B * C
    bytes_accessed = 3 * B * L * C * x.dtype.itemsize + A.size * A.dtype.itemsize
    cost = pl.CostEstimate(flops=flops, transcendentals=0,
                           bytes_accessed=bytes_accessed)

    if C >= _LANE:
        # ---- main path: grid directly over (B, L, C), no transposes --------
        tc = _lane_tile(C, B)
        grid = (B, pl.cdiv(C, tc))
        sea, mean = pl.pallas_call(
            _decomp_kernel,
            out_shape=(jax.ShapeDtypeStruct((B, L, C), x.dtype),
                       jax.ShapeDtypeStruct((B, L, C), x.dtype)),
            grid=grid,
            in_specs=[
                pl.BlockSpec((L, L), lambda b, c: (0, 0)),        # constant A
                pl.BlockSpec((None, L, tc), lambda b, c: (b, 0, c)),
            ],
            out_specs=(
                pl.BlockSpec((None, L, tc), lambda b, c: (b, 0, c)),
                pl.BlockSpec((None, L, tc), lambda b, c: (b, 0, c)),
            ),
            compiler_params=pltpu.CompilerParams(
                dimension_semantics=("parallel", "parallel"),
                vmem_limit_bytes=_vmem_limit_bytes(
                    L, tc, x.dtype.itemsize, A.dtype.itemsize),
            ),
            cost_estimate=cost,
        )(A, x)
        return sea, mean

    # ---- fallback (C < 128): lane-dense (L, B*C) slab -----------------------
    N = B * C
    x2 = jnp.transpose(x, (1, 0, 2)).reshape(L, N)
    tn = _lane_tile(N, 1)
    grid = (pl.cdiv(N, tn),)
    sea2, mean2 = pl.pallas_call(
        _decomp_kernel,
        out_shape=(jax.ShapeDtypeStruct((L, N), x.dtype),
                   jax.ShapeDtypeStruct((L, N), x.dtype)),
        grid=grid,
        in_specs=[
            pl.BlockSpec((L, L), lambda i: (0, 0)),
            pl.BlockSpec((L, tn), lambda i: (0, i)),
        ],
        out_specs=(
            pl.BlockSpec((L, tn), lambda i: (0, i)),
            pl.BlockSpec((L, tn), lambda i: (0, i)),
        ),
        compiler_params=pltpu.CompilerParams(
            dimension_semantics=("parallel",),
            vmem_limit_bytes=_vmem_limit_bytes(
                L, tn, x.dtype.itemsize, A.dtype.itemsize),
        ),
        cost_estimate=cost,
    )(A, x2)
    sea = sea2.reshape(L, B, C).transpose(1, 0, 2)
    mean = mean2.reshape(L, B, C).transpose(1, 0, 2)
    return sea, mean


# ---------------------------------------------------------------------------
# plain-JAX reference mirroring the PyTorch forward
# ---------------------------------------------------------------------------
def _replicate_pad(x, k):
    p = (k - 1) // 2
    front = jnp.repeat(x[:, 0:1, :], p, axis=1)
    end = jnp.repeat(x[:, -1:, :], p, axis=1)
    return jnp.concatenate([front, x, end], axis=1)


def _reference(x, kernel_sizes=KERNEL_SIZES):
    means, ress = [], []
    L = x.shape[1]
    for k in kernel_sizes:
        xp = _replicate_pad(x, k)
        m = jnp.stack([xp[:, j:j + L, :] for j in range(k)], axis=0).mean(0)
        means.append(m)
        ress.append(x - m)
    sea = sum(ress) / len(ress)
    moving_mean = sum(means) / len(means)
    return sea, moving_mean


if __name__ == "__main__":
    k0, k1 = jax.random.split(jax.random.PRNGKey(0))

    # slab-fallback path (C < 128)
    x_small = jax.random.normal(k0, (2, 16, 8), dtype=jnp.float32)
    sea, mean = series_decomp_multi(x_small)
    jax.block_until_ready((sea, mean))
    sea_ref, mean_ref = _reference(x_small)
    np.testing.assert_allclose(np.asarray(sea), np.asarray(sea_ref),
                               rtol=1e-5, atol=1e-5)
    np.testing.assert_allclose(np.asarray(mean), np.asarray(mean_ref),
                               rtol=1e-5, atol=1e-5)

    # main transpose-free path (C >= 128)
    x_wide = jax.random.normal(k1, (2, 24, 128), dtype=jnp.float32)
    sea_w, mean_w = series_decomp_multi(x_wide)
    jax.block_until_ready((sea_w, mean_w))
    sea_wr, mean_wr = _reference(x_wide)
    np.testing.assert_allclose(np.asarray(sea_w), np.asarray(sea_wr),
                               rtol=1e-5, atol=1e-5)
    np.testing.assert_allclose(np.asarray(mean_w), np.asarray(mean_wr),
                               rtol=1e-5, atol=1e-5)

    print("KERNEL_OK")
</pallas_src>

<mosaic_0001>
module attributes {stable_mosaic.version = 11 : i64} {
  func.func @_decomp_kernel(%arg0: i32, %arg1: memref<16x16xf32, #tpu.memory_space<vmem>>, %arg2: memref<16x16xf32, #tpu.memory_space<vmem>>, %arg3: memref<16x16xf32, #tpu.memory_space<vmem>>, %arg4: memref<16x16xf32, #tpu.memory_space<vmem>>) attributes {dimension_semantics = [#tpu.dimension_semantics<parallel>], iteration_bounds = array<i64: 1>, scalar_prefetch = 0 : i64, scratch_operands = 0 : i64, tpu.core_type = #tpu.core_type<tc>, window_params = [{pipeline_mode = #tpu.pipeline_mode<synchronous>, transform_indices = @transform_0, window_bounds = array<i64: 16, 16>}, {transform_indices = @transform_1, window_bounds = array<i64: 16, 16>}, {transform_indices = @transform_2, window_bounds = array<i64: 16, 16>}, {transform_indices = @transform_3, window_bounds = array<i64: 16, 16>}]} {
    %c0 = arith.constant 0 : index
    %c0_0 = arith.constant 0 : index
    %0 = vector.load %arg2[%c0, %c0_0] : memref<16x16xf32, #tpu.memory_space<vmem>>, vector<16x16xf32>
    %c0_1 = arith.constant 0 : index
    %c0_2 = arith.constant 0 : index
    %1 = vector.load %arg1[%c0_1, %c0_2] : memref<16x16xf32, #tpu.memory_space<vmem>>, vector<16x16xf32>
    %cst = arith.constant dense<0.000000e+00> : vector<16x16xf32>
    %2 = tpu.matmul %1, %0, %cst {dimension_numbers = #tpu.dot_dimension_numbers<[1], [0], [0], [1], [0, 0, 1, 1], [], []>} : vector<16x16xf32>, vector<16x16xf32>, vector<16x16xf32> -> vector<16x16xf32>
    %3 = arith.subf %0, %2 : vector<16x16xf32>
    %c0_3 = arith.constant 0 : index
    %c0_4 = arith.constant 0 : index
    %4 = vector.load %arg3[%c0_3, %c0_4] : memref<16x16xf32, #tpu.memory_space<vmem>>, vector<16x16xf32>
    tpu.vector_store %arg3[%c0_3, %c0_4], %3 {strides = array<i32>} : memref<16x16xf32, #tpu.memory_space<vmem>>, vector<16x16xf32>,
    %c0_5 = arith.constant 0 : index
    %c0_6 = arith.constant 0 : index
    %5 = vector.load %arg4[%c0_5, %c0_6] : memref<16x16xf32, #tpu.memory_space<vmem>>, vector<16x16xf32>
    tpu.vector_store %arg4[%c0_5, %c0_6], %2 {strides = array<i32>} : memref<16x16xf32, #tpu.memory_space<vmem>>, vector<16x16xf32>,
    return
  }
  func.func @transform_0(%arg0: i32) -> (i32, i32) {
    %c0_i32 = arith.constant 0 : i32
    %c0_i32_0 = arith.constant 0 : i32
    %c0_i32_1 = arith.constant 0 : i32
    return %c0_i32, %c0_i32_0 : i32, i32
  }
  func.func @transform_1(%arg0: i32) -> (i32, i32) {
    %c0_i32 = arith.constant 0 : i32
    %c0_i32_0 = arith.constant 0 : i32
    return %c0_i32, %arg0 : i32, i32
  }
  func.func @transform_2(%arg0: i32) -> (i32, i32) {
    %c0_i32 = arith.constant 0 : i32
    %c0_i32_0 = arith.constant 0 : i32
    return %c0_i32, %arg0 : i32, i32
  }
  func.func @transform_3(%arg0: i32) -> (i32, i32) {
    %c0_i32 = arith.constant 0 : i32
    %c0_i32_0 = arith.constant 0 : i32
    return %c0_i32, %arg0 : i32, i32
  }
}

</mosaic_0001>

<bundles_post_ra>
// kernel: tpu_custom_call.1
= control target key start
LH: loop header
LB: loop body
LE: loop exit
PB: predicated region body
PF: predicated region fallthrough
CT: control target
= control target key end

     0   :  { %9 = vsyncpa [#allocation3], 0  ;;  %s332_s0 = inlined_call_operand.hbm [shape: f32[16,16], index: 0, kind: input, shape index: {}]   ;;  %s333_s1 = inlined_call_operand.hbm [shape: f32[16,16], index: 1, kind: input, shape index: {}]   ;;  %s334_s2 = inlined_call_operand.hbm [shape: f32[16,16], index: 2, kind: output, shape index: {0}]   ;;  %s335_s3 = inlined_call_operand.hbm [shape: f32[16,16], index: 3, kind: output, shape index: {1}]  }
   0x1   :  { %10 = vsyncpa [#allocation6], 0 }
   0x2   :  { %11 = vsyncpa [#allocation4], 0 }
   0x3   :  { %12 = vsyncpa [#allocation9], 0  ;;  %s276_s12 = smov [#allocation2]  }
   0x4   :  { %s18_s13 = sshll.u32 %s276_s12, 4  ;;  %s19_s13 = int_to_ptr.vmem [resolvable:$true] %s18_s13 }
   0x5   :  { %s196_s14 = scalar_lea.vmem %s19_s13, 256  ;;  %p201_p1 = scmp.lt.s32.totalorder %s19_s13, %s19_s13 }
   0x6   :  { %p197_p0 = scmp.ne.s32.totalorder %s19_s13, %s196_s14  ;;  %p202_p2 = scmp.lt.s32.totalorder %s196_s14, %s196_s14 }
   0x8   :  { %p203_p3 = por %p202_p2, %p201_p1 }
   0xa   :  { %p204_p4 = pnand %p203_p3, %p197_p0 }
   0xc   :  { %207 = shalt.err (!%p204_p4)
}
   0xd   :  { %s277_s15 = smov 128   ;;  %s278_s16 = smov 8  }
   0xe   :  { %24 = dma.hbm_to_vmem [thread:$0]  %s332_s0, 256, %s19_s13, [#allocation3], %s277_s15, %s277_s15, %s278_s16  }
   0xf   :  { %s279_s19 = smov [#allocation5]  }
  0x10   :  { %s30_s20 = sshll.u32 %s279_s19, 4  ;;  %s31_s20 = int_to_ptr.vmem [resolvable:$true] %s30_s20 }
  0x11   :  { %s216_s21 = scalar_lea.vmem %s31_s20, 256  ;;  %p221_p6 = scmp.lt.s32.totalorder %s31_s20, %s31_s20 }
  0x12   :  { %p217_p5 = scmp.ne.s32.totalorder %s31_s20, %s216_s21  ;;  %p222_p7 = scmp.lt.s32.totalorder %s216_s21, %s216_s21 }
  0x14   :  { %p223_p8 = por %p222_p7, %p221_p6 }
  0x16   :  { %p224_p9 = pnand %p223_p8, %p217_p5 }
  0x18   :  { %227 = shalt.err (!%p224_p9)
}
  0x19   :  { %36 = dma.hbm_to_vmem [thread:$0]  %s333_s1, 256, %s31_s20, [#allocation6], %s277_s15, %s277_s15, %s278_s16  }
  0x1a   :  { %268 = dma.done.wait [#allocation3], 256  }
  0x1b   :  { %269 = vsyncadd [#allocation3], 4294967040 }
  0x1c   :  { %270 = dma.done.wait [#allocation6], 256  }
  0x1d   :  { %271 = vsyncadd [#allocation6], 4294967040  ;;  %vm47_vm0 = vcmask 130048   ;;  %v44_v0 = vld [vmem:[#allocation5 + $0x8] sm:$0xff]  ;;  %v43_v1 = vld [vmem:[#allocation5] sm:$0xff]  ;;  %s280_s0 = smov [#allocation8]  }
  0x1e   :  { %v45_v2 = vld [vmem:[#allocation2] sm:$0xff]  ;;  %175 = vmatprep.subr.mxu0 %v44_v0  ;;  %v46_v3 = vld [vmem:[#allocation2 + $0x8] sm:$0xff]  ;;  %s152_s24 = sshll.u32 %s280_s0, 4  ;;  %s281_s1 = smov [#allocation7]   ;;  %s153_s24 = int_to_ptr.vmem [resolvable:$true] %s152_s24 }
  0x1f   :  { %179 = vmatprep.mubr.msk.f32.mxu0 %vm47_vm0, %v45_v2  ;;  %176 = vmatpush3.msra.mxu0 %v44_v0  ;;  %s140_s25 = sshll.u32 %s281_s1, 4  ;;  %s228_s26 = scalar_lea.vmem %s153_s24, 256  ;;  %s141_s25 = int_to_ptr.vmem [resolvable:$true] %s140_s25 }
  0x20   :  { %177 = vmatprep.subr.mxu0 %v43_v1  ;;  %p229_p10 = scmp.ne.s32.totalorder %s153_s24, %s228_s26  ;;  %p233_p11 = scmp.lt.s32.totalorder %s153_s24, %s153_s24 }
  0x21   :  { %178 = vmatpush3.msra.mxu0 %v43_v1  ;;  %p234_p12 = scmp.lt.s32.totalorder %s228_s26, %s228_s26 }
  0x22   :  { %180 = vmatmul.mubr.msk.f32.vlgmr.msra.gmra.mxu0 %vm47_vm0, %v46_v3 }
  0x23   :  { %p235_p13 = por %p234_p12, %p233_p11 }
  0x25   :  { %p236_p0 = pnand %p235_p13, %p229_p10 }
  0xe2   :  { %v181_v4 = vpop.f32.mrf.mxu0 }
  0xe3   :  { %v130_v5 = vsub.f32 %v44_v0, %v181_v4  ;;  %134 = vst.msk [vmem:[#allocation8 + $0x8] sm:$0xff] %vm47_vm0, %v181_v4 }
  0xe4   :  { %v120_v6 = vpop.f32.mrf.mxu0 }
  0xe5   :  { %132 = vst.msk [vmem:[#allocation7 + $0x8] sm:$0xff] %vm47_vm0, %v130_v5  ;;  %v129_v7 = vsub.f32 %v43_v1, %v120_v6  ;;  %133 = vst.msk [vmem:[#allocation8] sm:$0xff] %vm47_vm0, %v120_v6 }
  0xe6   :  { %239 = shalt.err (!%p236_p0)
}
  0xe7   :  { %158 = dma.vmem_to_hbm [thread:$0]  %s153_s24, 256, %s335_s3, [#allocation9], %s277_s15, %s277_s15, %s278_s16   ;;  %131 = vst.msk [vmem:[#allocation7] sm:$0xff] %vm47_vm0, %v129_v7 }
  0xe8   :  { %s248_s29 = scalar_lea.vmem %s141_s25, 256  ;;  %p253_p2 = scmp.lt.s32.totalorder %s141_s25, %s141_s25 }
  0xe9   :  { %p249_p1 = scmp.ne.s32.totalorder %s141_s25, %s248_s29  ;;  %p254_p3 = scmp.lt.s32.totalorder %s248_s29, %s248_s29 }
  0xeb   :  { %p255_p4 = por %p254_p3, %p253_p2 }
  0xed   :  { %p256_p5 = pnand %p255_p4, %p249_p1 }
  0xef   :  { %259 = shalt.err (!%p256_p5)
}
  0xf0   :  { %146 = dma.vmem_to_hbm [thread:$0]  %s141_s25, 256, %s334_s2, [#allocation4], %s277_s15, %s277_s15, %s278_s16  }
  0xf1   :  { %272 = dma.done.wait [#allocation4], 256  }
  0xf2   :  { %273 = vsyncadd [#allocation4], 4294967040 }
  0xf3   :  { %274 = dma.done.wait [#allocation9], 256  }
  0xf4   :  { %275 = vsyncadd [#allocation9], 4294967040 }
  0xf5   :  { %165 = vsyncpa [#allocation3], 1 }
  0xf6   :  { %166 = vsyncpa [#allocation6], 1 }
  0xf7   :  { %167 = vsyncpa [#allocation4], 1 }
  0xf8   :  { %168 = vsyncpa [#allocation9], 1 }

</bundles_post_ra>
